<compile_context>
chip_gen: v7x
topology: tpu7x:2x2x1
jax: 0.10.0
libtpu: 0.0.40
codegen_flags: <defaults>
</compile_context>

<pallas_src>
import jax
import jax.numpy as jnp
from jax.experimental import pallas as pl
from jax.experimental.pallas import tpu as pltpu

# Module constants (from the PyTorch file)
INPUT_DIM = 512
HIDDEN_DIM = 256
DROPOUT_RATE = 0.45584099758281393  # unused at inference (eval mode -> identity)

_TB_MAX = 1024  # max batch tile: multiple of 256 (fills 256x256 MXU rows on
                # v6e/v7x, also a 128-multiple for v5e) and small enough that
                # 2 inputs x 2 buffers x TB x 512 x 2B (bf16) = 4 MiB.


def _round_up(x, m):
    return ((x + m - 1) // m) * m


def _mlp_kernel(img_ref, txt_ref, w1_ref, b1_ref, w2_ref, b2_ref, out_ref):
    """Fused forward pass for one batch tile.

    img_ref: (TB, D)  bf16     txt_ref: (TB, D)  bf16
    w1_ref : (2D, H)  bf16     b1_ref : (1, H)   f32
    w2_ref : (1, H)   f32      b2_ref : (1, 1)   f32
    out_ref: (TB, 1)  f32
    """
    d = img_ref.shape[1]

    # cat((img, txt), dim=1) @ W1  ==  img @ W1[:D] + txt @ W1[D:]
    # bf16 operands on the MXU, f32 accumulation.
    h = jnp.dot(img_ref[...], w1_ref[:d, :], preferred_element_type=jnp.float32)
    h = h + jnp.dot(txt_ref[...], w1_ref[d:, :], preferred_element_type=jnp.float32)
    h = jnp.maximum(h + b1_ref[...], 0.0)      # bias + ReLU (f32, VPU)

    # Dropout: identity at inference time (model.eval()).
    # TODO(synk): training-mode dropout (RNG mask) intentionally not implemented.

    # fc2 has out_features=1: a (TB,H)x(H,1) MXU matmul would waste 255/256 of
    # the array, so do it as VPU multiply + XLU lane reduction instead.
    logit = jnp.sum(h * w2_ref[...], axis=-1, keepdims=True) + b2_ref[...]

    # Sigmoid: EUP exp + approx reciprocal (keeps VALU slots clear).
    out_ref[...] = pl.reciprocal(1.0 + jnp.exp(-logit), approx=True)


def multimodal_classifier_forward(image_embedding, text_embedding, params,
                                  *, tb_max=_TB_MAX):
    """image_embedding, text_embedding: (B, INPUT_DIM) -> (B, 1) float32."""
    w1, b1, w2_row, b2 = params
    B, D = image_embedding.shape
    H = b1.shape[1]

    # bf16 for the layer-1 matmul operands (f32 accumulation in-kernel).
    img = image_embedding.astype(jnp.bfloat16)
    txt = text_embedding.astype(jnp.bfloat16)
    w1_bf16 = w1.astype(jnp.bfloat16)
    b1_f32 = b1.astype(jnp.float32)
    w2_f32 = w2_row.astype(jnp.float32)
    b2_f32 = b2.astype(jnp.float32)

    # Batch tile: multiple of 16 (bf16 sublane pack), capped at tb_max.
    TB = min(tb_max, _round_up(B, 16))
    B_pad = _round_up(B, TB)
    if B_pad != B:
        pad = ((0, B_pad - B), (0, 0))
        img = jnp.pad(img, pad)
        txt = jnp.pad(txt, pad)
    grid = (pl.cdiv(B_pad, TB),)

    cost = pl.CostEstimate(
        flops=2 * B_pad * (2 * D) * H + 3 * B_pad * H,
        transcendentals=B_pad,
        bytes_accessed=2 * B_pad * D * 2 + (2 * D) * H * 2 + (2 * H + 1) * 4
                       + B_pad * 4,
    )

    out = pl.pallas_call(
        _mlp_kernel,
        out_shape=jax.ShapeDtypeStruct((B_pad, 1), jnp.float32),
        grid=grid,
        in_specs=[
            pl.BlockSpec((TB, D), lambda i: (i, 0)),       # img tile (streamed)
            pl.BlockSpec((TB, D), lambda i: (i, 0)),       # txt tile (streamed)
            pl.BlockSpec((2 * D, H), lambda i: (0, 0)),    # w1: VMEM-resident
            pl.BlockSpec((1, H), lambda i: (0, 0)),        # b1
            pl.BlockSpec((1, H), lambda i: (0, 0)),        # w2 row
            pl.BlockSpec((1, 1), lambda i: (0, 0)),        # b2
        ],
        out_specs=pl.BlockSpec((TB, 1), lambda i: (i, 0)),
        compiler_params=pltpu.CompilerParams(
            dimension_semantics=("parallel",),             # 2 TCs on v7x
        ),
        cost_estimate=cost,
    )(img, txt, w1_bf16, b1_f32, w2_f32, b2_f32)

    return out[:B]


def init_params(key, input_dim=INPUT_DIM, hidden_dim=HIDDEN_DIM):
    """Deterministic synthetic params (f32 master copies).

    w1 is nn.Linear(input_dim*2, hidden_dim).weight stored transposed (in, out);
    w2_row is nn.Linear(hidden_dim, 1).weight in its native (1, hidden_dim) layout.
    """
    k1, k2, k3, k4 = jax.random.split(key, 4)
    fan1 = input_dim * 2
    w1 = jax.random.uniform(k1, (fan1, hidden_dim), jnp.float32,
                            -1.0 / jnp.sqrt(fan1), 1.0 / jnp.sqrt(fan1))
    b1 = jax.random.uniform(k2, (1, hidden_dim), jnp.float32,
                            -1.0 / jnp.sqrt(fan1), 1.0 / jnp.sqrt(fan1))
    w2_row = jax.random.uniform(k3, (1, hidden_dim), jnp.float32,
                                -1.0 / jnp.sqrt(hidden_dim),
                                1.0 / jnp.sqrt(hidden_dim))
    b2 = jax.random.uniform(k4, (1, 1), jnp.float32,
                            -1.0 / jnp.sqrt(hidden_dim),
                            1.0 / jnp.sqrt(hidden_dim))
    return w1, b1, w2_row, b2


def _reference_forward(image_embedding, text_embedding, params, *, bf16=True):
    """Pure-JAX reference. bf16=True mirrors the kernel's matmul precision."""
    w1, b1, w2_row, b2 = params
    x = jnp.concatenate([image_embedding, text_embedding], axis=1)
    w1m = w1
    if bf16:
        x = x.astype(jnp.bfloat16)
        w1m = w1.astype(jnp.bfloat16)
    h = jnp.maximum(jnp.dot(x, w1m, preferred_element_type=jnp.float32) + b1, 0.0)
    logit = h @ w2_row.T + b2
    return jax.nn.sigmoid(logit)


if __name__ == "__main__":
    key = jax.random.PRNGKey(0)
    k_img, k_txt, k_params, k_img2, k_txt2 = jax.random.split(key, 5)
    params = init_params(k_params)

    # --- small batch, single tile ---
    B = 8
    image_embedding = jax.random.normal(k_img, (B, INPUT_DIM), jnp.float32)
    text_embedding = jax.random.normal(k_txt, (B, INPUT_DIM), jnp.float32)

    out = multimodal_classifier_forward(image_embedding, text_embedding, params)
    out = jax.block_until_ready(out)
    assert out.shape == (B, 1)

    ref_bf16 = _reference_forward(image_embedding, text_embedding, params, bf16=True)
    ref_f32 = _reference_forward(image_embedding, text_embedding, params, bf16=False)
    assert jnp.allclose(out, ref_bf16, atol=2e-3, rtol=2e-3), "mismatch vs bf16 reference"
    assert jnp.allclose(out, ref_f32, atol=2e-2, rtol=2e-2), "mismatch vs f32 reference"

    # --- uneven batch with a small tile: exercises grid, padding, pipelining ---
    B2 = 300
    img2 = jax.random.normal(k_img2, (B2, INPUT_DIM), jnp.float32)
    txt2 = jax.random.normal(k_txt2, (B2, INPUT_DIM), jnp.float32)
    out2 = multimodal_classifier_forward(img2, txt2, params, tb_max=128)
    out2 = jax.block_until_ready(out2)
    assert out2.shape == (B2, 1)
    ref2 = _reference_forward(img2, txt2, params, bf16=True)
    assert jnp.allclose(out2, ref2, atol=2e-3, rtol=2e-3), "tiled mismatch vs reference"

    print("KERNEL_OK")
</pallas_src>

<mosaic_0001>
module attributes {stable_mosaic.version = 11 : i64} {
  func.func @_mlp_kernel(%arg0: i32, %arg1: memref<16x512xbf16, #tpu.memory_space<vmem>>, %arg2: memref<16x512xbf16, #tpu.memory_space<vmem>>, %arg3: memref<1024x256xbf16, #tpu.memory_space<vmem>>, %arg4: memref<1x256xf32, #tpu.memory_space<vmem>>, %arg5: memref<1x256xf32, #tpu.memory_space<vmem>>, %arg6: memref<1x1xf32, #tpu.memory_space<vmem>>, %arg7: memref<16x1xf32, #tpu.memory_space<vmem>>) attributes {dimension_semantics = [#tpu.dimension_semantics<parallel>], iteration_bounds = array<i64: 1>, scalar_prefetch = 0 : i64, scratch_operands = 0 : i64, tpu.core_type = #tpu.core_type<tc>, window_params = [{transform_indices = @transform_0, window_bounds = array<i64: 16, 512>}, {transform_indices = @transform_1, window_bounds = array<i64: 16, 512>}, {pipeline_mode = #tpu.pipeline_mode<synchronous>, transform_indices = @transform_2, window_bounds = array<i64: 1024, 256>}, {pipeline_mode = #tpu.pipeline_mode<synchronous>, transform_indices = @transform_3, window_bounds = array<i64: 1, 256>}, {pipeline_mode = #tpu.pipeline_mode<synchronous>, transform_indices = @transform_4, window_bounds = array<i64: 1, 256>}, {pipeline_mode = #tpu.pipeline_mode<synchronous>, transform_indices = @transform_5, window_bounds = array<i64: 1, 1>}, {transform_indices = @transform_6, window_bounds = array<i64: 16, 1>}]} {
    %c0 = arith.constant 0 : index
    %c0_0 = arith.constant 0 : index
    %0 = vector.load %arg1[%c0, %c0_0] : memref<16x512xbf16, #tpu.memory_space<vmem>>, vector<16x512xbf16>
    %c0_1 = arith.constant 0 : index
    %c0_2 = arith.constant 0 : index
    %1 = vector.load %arg3[%c0_1, %c0_2] : memref<1024x256xbf16, #tpu.memory_space<vmem>>, vector<512x256xbf16>
    %cst = arith.constant dense<0.000000e+00> : vector<16x256xf32>
    %2 = tpu.matmul %0, %1, %cst {dimension_numbers = #tpu.dot_dimension_numbers<[1], [0], [0], [1], [0, 0, 1, 1], [], []>} : vector<16x512xbf16>, vector<512x256xbf16>, vector<16x256xf32> -> vector<16x256xf32>
    %c0_3 = arith.constant 0 : index
    %c0_4 = arith.constant 0 : index
    %3 = vector.load %arg2[%c0_3, %c0_4] : memref<16x512xbf16, #tpu.memory_space<vmem>>, vector<16x512xbf16>
    %c512 = arith.constant 512 : index
    %c0_5 = arith.constant 0 : index
    %4 = vector.load %arg3[%c512, %c0_5] : memref<1024x256xbf16, #tpu.memory_space<vmem>>, vector<512x256xbf16>
    %cst_6 = arith.constant dense<0.000000e+00> : vector<16x256xf32>
    %5 = tpu.matmul %3, %4, %cst_6 {dimension_numbers = #tpu.dot_dimension_numbers<[1], [0], [0], [1], [0, 0, 1, 1], [], []>} : vector<16x512xbf16>, vector<512x256xbf16>, vector<16x256xf32> -> vector<16x256xf32>
    %6 = arith.addf %2, %5 : vector<16x256xf32>
    %c0_7 = arith.constant 0 : index
    %c0_8 = arith.constant 0 : index
    %7 = vector.load %arg4[%c0_7, %c0_8] : memref<1x256xf32, #tpu.memory_space<vmem>>, vector<1x256xf32>
    %8 = vector.broadcast %7 : vector<1x256xf32> to vector<16x256xf32>
    %9 = arith.addf %6, %8 : vector<16x256xf32>
    %cst_9 = arith.constant 0.000000e+00 : f32
    %10 = vector.broadcast %cst_9 : f32 to vector<16x256xf32>
    %11 = arith.maximumf %9, %10 : vector<16x256xf32>
    %c0_10 = arith.constant 0 : index
    %c0_11 = arith.constant 0 : index
    %12 = vector.load %arg5[%c0_10, %c0_11] : memref<1x256xf32, #tpu.memory_space<vmem>>, vector<1x256xf32>
    %13 = vector.broadcast %12 : vector<1x256xf32> to vector<16x256xf32>
    %14 = arith.mulf %11, %13 : vector<16x256xf32>
    %cst_12 = arith.constant dense<0.000000e+00> : vector<16xf32>
    %15 = vector.multi_reduction <add>, %14, %cst_12 [1] : vector<16x256xf32> to vector<16xf32>
    %16 = vector.shape_cast %15 : vector<16xf32> to vector<16x1xf32>
    %c0_13 = arith.constant 0 : index
    %c0_14 = arith.constant 0 : index
    %17 = vector.load %arg6[%c0_13, %c0_14] : memref<1x1xf32, #tpu.memory_space<vmem>>, vector<1x1xf32>
    %18 = vector.broadcast %17 : vector<1x1xf32> to vector<16x1xf32>
    %19 = arith.addf %16, %18 : vector<16x1xf32>
    %cst_15 = arith.constant 0.000000e+00 : f32
    %20 = vector.broadcast %cst_15 : f32 to vector<16x1xf32>
    %21 = arith.subf %20, %19 : vector<16x1xf32>
    %22 = math.exp %21 : vector<16x1xf32>
    %cst_16 = arith.constant 1.000000e+00 : f32
    %23 = vector.broadcast %cst_16 : f32 to vector<16x1xf32>
    %24 = arith.addf %23, %22 : vector<16x1xf32>
    %25 = tpu.reciprocal %24 {approx = true} : vector<16x1xf32> -> vector<16x1xf32>
    %c0_17 = arith.constant 0 : index
    %c0_18 = arith.constant 0 : index
    %26 = vector.load %arg7[%c0_17, %c0_18] : memref<16x1xf32, #tpu.memory_space<vmem>>, vector<16x1xf32>
    tpu.vector_store %arg7[%c0_17, %c0_18], %25 {strides = array<i32>} : memref<16x1xf32, #tpu.memory_space<vmem>>, vector<16x1xf32>,
    return
  }
  func.func @transform_0(%arg0: i32) -> (i32, i32) {
    %c0_i32 = arith.constant 0 : i32
    %c0_i32_0 = arith.constant 0 : i32
    return %arg0, %c0_i32 : i32, i32
  }
  func.func @transform_1(%arg0: i32) -> (i32, i32) {
    %c0_i32 = arith.constant 0 : i32
    %c0_i32_0 = arith.constant 0 : i32
    return %arg0, %c0_i32 : i32, i32
  }
  func.func @transform_2(%arg0: i32) -> (i32, i32) {
    %c0_i32 = arith.constant 0 : i32
    %c0_i32_0 = arith.constant 0 : i32
    %c0_i32_1 = arith.constant 0 : i32
    return %c0_i32, %c0_i32_0 : i32, i32
  }
  func.func @transform_3(%arg0: i32) -> (i32, i32) {
    %c0_i32 = arith.constant 0 : i32
    %c0_i32_0 = arith.constant 0 : i32
    %c0_i32_1 = arith.constant 0 : i32
    return %c0_i32, %c0_i32_0 : i32, i32
  }
  func.func @transform_4(%arg0: i32) -> (i32, i32) {
    %c0_i32 = arith.constant 0 : i32
    %c0_i32_0 = arith.constant 0 : i32
    %c0_i32_1 = arith.constant 0 : i32
    return %c0_i32, %c0_i32_0 : i32, i32
  }
  func.func @transform_5(%arg0: i32) -> (i32, i32) {
    %c0_i32 = arith.constant 0 : i32
    %c0_i32_0 = arith.constant 0 : i32
    %c0_i32_1 = arith.constant 0 : i32
    return %c0_i32, %c0_i32_0 : i32, i32
  }
  func.func @transform_6(%arg0: i32) -> (i32, i32) {
    %c0_i32 = arith.constant 0 : i32
    %c0_i32_0 = arith.constant 0 : i32
    return %arg0, %c0_i32 : i32, i32
  }
}

</mosaic_0001>

<bundles_post_ra>
// kernel: tpu_custom_call.1
= control target key start
LH: loop header
LB: loop body
LE: loop exit
PB: predicated region body
PF: predicated region fallthrough
CT: control target
= control target key end

     0   :  { %s1662_s0 = inlined_call_operand.hbm [shape: bf16[16,512], index: 0, kind: input, shape index: {}]   ;;  %s1663_s1 = inlined_call_operand.hbm [shape: bf16[16,512], index: 1, kind: input, shape index: {}]   ;;  %s1664_s2 = inlined_call_operand.hbm [shape: bf16[1024,256], index: 2, kind: input, shape index: {}]   ;;  %s1665_s3 = inlined_call_operand.vmem [shape: f32[1,256], index: 3, kind: input, shape index: {}]   ;;  %s1666_s4 = inlined_call_operand.vmem [shape: f32[1,256], index: 4, kind: input, shape index: {}]   ;;  %s1667_s5 = inlined_call_operand.<no memory space> [shape: f32[1,1], index: 5, kind: input, shape index: {}]   ;;  %s1668_s6 = inlined_call_operand.vmem [shape: f32[16,1], index: 6, kind: output, shape index: {}]  }
   0x1   :  { %v11_v0 = vstv %s1667_s5 }
   0x2   :  { %12 = vst [vmem:[#allocation2] sm:$0x1] %v11_v0 }
   0x3   :  { %13 = vsyncpa [#allocation4], 0 }
   0x4   :  { %14 = vsyncpa [#allocation6], 0  ;;  %s1562_s23 = smov [#allocation5]   ;;  %s1563_s25 = smov [#allocation3]  }
   0x5   :  { %s32_s24 = sshll.u32 %s1562_s23, 4  ;;  %s20_s26 = sshll.u32 %s1563_s25, 4  ;;  %s33_s24 = int_to_ptr.vmem [resolvable:$true] %s32_s24  ;;  %s1607_s26 = int_to_ptr.vmem [resolvable:$true] %s20_s26 }
   0x6   :  { %s1492_s29 = scalar_lea.hbm %s1663_s1, 512 }
   0x7   :  { %p1493_p0 = scmp.ne.s32.totalorder %s1663_s1, %s1492_s29  ;;  %p1496_p1 = scmp.lt.u32.totalorder %s1492_s29, %s1663_s1 }
   0x9   :  { %p1498_p2 = pnand %p1496_p1, %p1493_p0 }
   0xb   :  { %1501 = shalt.err (!%p1498_p2)
}
   0xc   :  { %s1502_s9 = scalar_lea.vmem %s33_s24, 512  ;;  %p1507_p4 = scmp.lt.s32.totalorder %s33_s24, %s33_s24 }
   0xd   :  { %p1503_p3 = scmp.ne.s32.totalorder %s33_s24, %s1502_s9  ;;  %p1508_p5 = scmp.lt.s32.totalorder %s1502_s9, %s1502_s9 }
   0xf   :  { %p1509_p6 = por %p1508_p5, %p1507_p4 }
  0x11   :  { %p1510_p7 = pnand %p1509_p6, %p1503_p3 }
  0x13   :  { %1513 = shalt.err (!%p1510_p7)
}
  0x14   :  { %s1564_s10 = smov 256   ;;  %s1565_s11 = smov 16  }
  0x15   :  { %38 = dma.hbm_to_vmem [thread:$0]  %s1663_s1, 512, %s33_s24, [#allocation6], %s1564_s10, %s1564_s10, %s1565_s11  }
  0x16   :  { %s1514_s16 = scalar_lea.hbm %s1662_s0, 512 }
  0x17   :  { %p1515_p8 = scmp.ne.s32.totalorder %s1662_s0, %s1514_s16  ;;  %p1518_p9 = scmp.lt.u32.totalorder %s1514_s16, %s1662_s0 }
  0x19   :  { %p1520_p10 = pnand %p1518_p9, %p1515_p8 }
  0x1b   :  { %1523 = shalt.err (!%p1520_p10)
}
  0x1c   :  { %s1524_s21 = scalar_lea.vmem %s1607_s26, 512  ;;  %p1529_p12 = scmp.lt.s32.totalorder %s1607_s26, %s1607_s26 }
  0x1d   :  { %p1525_p11 = scmp.ne.s32.totalorder %s1607_s26, %s1524_s21  ;;  %p1530_p13 = scmp.lt.s32.totalorder %s1524_s21, %s1524_s21 }
  0x1f   :  { %p1531_p0 = por %p1530_p13, %p1529_p12 }
  0x21   :  { %p1532_p1 = pnand %p1531_p0, %p1525_p11 }
  0x23   :  { %1535 = shalt.err (!%p1532_p1)
}
  0x24   :  { %26 = dma.hbm_to_vmem [thread:$0]  %s1662_s0, 512, %s1607_s26, [#allocation4], %s1564_s10, %s1564_s10, %s1565_s11  }
  0x25   :  { %s1566_s23 = smov [#allocation7]   ;;  %s1536_s28 = scalar_lea.hbm %s1664_s2, 16384 }
  0x26   :  { %s44_s24 = sshll.u32 %s1566_s23, 4  ;;  %p1537_p2 = scmp.ne.s32.totalorder %s1664_s2, %s1536_s28  ;;  %s45_s24 = int_to_ptr.vmem [resolvable:$true] %s44_s24 }
  0x27   :  { %p1540_p3 = scmp.lt.u32.totalorder %s1536_s28, %s1664_s2 }
  0x29   :  { %p1542_p4 = pnand %p1540_p3, %p1537_p2 }
  0x2b   :  { %1545 = shalt.err (!%p1542_p4)
}
  0x2c   :  { %s1546_s5 = scalar_lea.vmem %s45_s24, 16384  ;;  %p1551_p6 = scmp.lt.s32.totalorder %s45_s24, %s45_s24 }
  0x2d   :  { %p1547_p5 = scmp.ne.s32.totalorder %s45_s24, %s1546_s5  ;;  %p1552_p7 = scmp.lt.s32.totalorder %s1546_s5, %s1546_s5 }
  0x2f   :  { %p1553_p8 = por %p1552_p7, %p1551_p6 }
  0x31   :  { %p1554_p9 = pnand %p1553_p8, %p1547_p5 }
  0x33   :  { %1557 = shalt.err (!%p1554_p9)
}
  0x34   :  { %s1567_s0 = smov 128   ;;  %s1568_s26 = smov 8  }
  0x35   :  { %50 = dma.hbm_to_vmem [thread:$0]  %s1664_s2, 16384, %s45_s24, [#allocation6], %s1567_s0, %s1567_s0, %s1568_s26  }
  0x36   :  { %1558 = dma.done.wait [#allocation4], 512  }
  0x37   :  { %1559 = vsyncadd [#allocation4], 4294966784 }
  0x38   :  { %1560 = dma.done.wait [#allocation6], 16896  }
  0x39   :  { %1561 = vsyncadd [#allocation6], 4294950400  ;;  %v1280_v1 = vld [vmem:[#allocation7 + $0x204] ss:$8 sps:$4 sm:$0xff]   ;;  %v1284_v3 = vld [vmem:[#allocation7 + $0x200] ss:$8 sps:$4 sm:$0xff]  }
  0x3a   :  { %v1282_v2 = vld [vmem:[#allocation7 + $0x4] ss:$8 sps:$4 sm:$0xff]   ;;  %542 = vmatprep.subr.bf16.mxu1 %v1280_v1  ;;  %v1285_v4 = vld [vmem:[#allocation7] ss:$8 sps:$4 sm:$0xff]   ;;  %v1286_v5 = vld [vmem:[#allocation7 + $0x214] ss:$8 sps:$4 sm:$0xff]  }
  0x3b   :  { %968 = vmatprep.subr.bf16.mxu0 %v1282_v2  ;;  %543 = vmatpush1.bf16.msra.mxu1 %v1284_v3  ;;  %v1288_v6 = vld [vmem:[#allocation7 + $0x14] ss:$8 sps:$4 sm:$0xff]   ;;  %v1290_v7 = vld [vmem:[#allocation7 + $0x210] ss:$8 sps:$4 sm:$0xff]   ;;  %v1292_v9 = vld [vmem:[#allocation7 + $0x224] ss:$8 sps:$4 sm:$0xff]  }
  0x3c   :  { %969 = vmatpush1.bf16.msra.mxu0 %v1285_v4  ;;  %544 = vmatprep.subr.bf16.mxu1 %v1286_v5  ;;  %v1291_v8 = vld [vmem:[#allocation7 + $0x10] ss:$8 sps:$4 sm:$0xff]   ;;  %v1294_v10 = vld [vmem:[#allocation7 + $0x24] ss:$8 sps:$4 sm:$0xff]   ;;  %v1296_v11 = vld [vmem:[#allocation7 + $0x220] ss:$8 sps:$4 sm:$0xff]  }
  0x3d   :  { %970 = vmatprep.subr.bf16.mxu0 %v1288_v6  ;;  %v1297_v12 = vld [vmem:[#allocation7 + $0x20] ss:$8 sps:$4 sm:$0xff]   ;;  %v1298_v13 = vld [vmem:[#allocation7 + $0x234] ss:$8 sps:$4 sm:$0xff]   ;;  %v1302_v15 = vld [vmem:[#allocation7 + $0x230] ss:$8 sps:$4 sm:$0xff]  }
  0x3e   :  { %v1300_v14 = vld [vmem:[#allocation7 + $0x34] ss:$8 sps:$4 sm:$0xff]   ;;  %v1303_v16 = vld [vmem:[#allocation7 + $0x30] ss:$8 sps:$4 sm:$0xff]   ;;  %v1304_v17 = vld [vmem:[#allocation7 + $0x244] ss:$8 sps:$4 sm:$0xff]  }
  0x3f   :  { %545 = vmatpush1.bf16.msra.mxu1 %v1290_v7  ;;  %v1306_v18 = vld [vmem:[#allocation7 + $0x44] ss:$8 sps:$4 sm:$0xff]   ;;  %v1308_v19 = vld [vmem:[#allocation7 + $0x240] ss:$8 sps:$4 sm:$0xff]   ;;  %v1310_v21 = vld [vmem:[#allocation7 + $0x254] ss:$8 sps:$4 sm:$0xff]  }
  0x40   :  { %971 = vmatpush1.bf16.msra.mxu0 %v1291_v8  ;;  %546 = vmatprep.subr.bf16.mxu1 %v1292_v9  ;;  %v1309_v20 = vld [vmem:[#allocation7 + $0x40] ss:$8 sps:$4 sm:$0xff]   ;;  %v1312_v22 = vld [vmem:[#allocation7 + $0x54] ss:$8 sps:$4 sm:$0xff]   ;;  %v1314_v23 = vld [vmem:[#allocation7 + $0x250] ss:$8 sps:$4 sm:$0xff]  }
  0x41   :  { %972 = vmatprep.subr.bf16.mxu0 %v1294_v10  ;;  %v1315_v24 = vld [vmem:[#allocation7 + $0x50] ss:$8 sps:$4 sm:$0xff]   ;;  %v1316_v25 = vld [vmem:[#allocation7 + $0x264] ss:$8 sps:$4 sm:$0xff]   ;;  %v1320_v27 = vld [vmem:[#allocation7 + $0x260] ss:$8 sps:$4 sm:$0xff]  }
  0x42   :  { %v1318_v26 = vld [vmem:[#allocation7 + $0x64] ss:$8 sps:$4 sm:$0xff]   ;;  %v1321_v28 = vld [vmem:[#allocation7 + $0x60] ss:$8 sps:$4 sm:$0xff]   ;;  %v1322_v29 = vld [vmem:[#allocation7 + $0x274] ss:$8 sps:$4 sm:$0xff]  }
  0x43   :  { %547 = vmatpush1.bf16.msra.mxu1 %v1296_v11  ;;  %v1324_v30 = vld [vmem:[#allocation7 + $0x74] ss:$8 sps:$4 sm:$0xff]   ;;  %v1326_v31 = vld [vmem:[#allocation7 + $0x270] ss:$8 sps:$4 sm:$0xff]   ;;  %v1328_v33 = vld [vmem:[#allocation7 + $0x284] ss:$8 sps:$4 sm:$0xff]  }
  0x44   :  { %973 = vmatpush1.bf16.msra.mxu0 %v1297_v12  ;;  %548 = vmatprep.subr.bf16.mxu1 %v1298_v13  ;;  %v1327_v32 = vld [vmem:[#allocation7 + $0x70] ss:$8 sps:$4 sm:$0xff]   ;;  %v1330_v34 = vld [vmem:[#allocation7 + $0x84] ss:$8 sps:$4 sm:$0xff]   ;;  %v1332_v35 = vld [vmem:[#allocation7 + $0x280] ss:$8 sps:$4 sm:$0xff]  }
  0x45   :  { %974 = vmatprep.subr.bf16.mxu0 %v1300_v14  ;;  %v1333_v36 = vld [vmem:[#allocation7 + $0x80] ss:$8 sps:$4 sm:$0xff]   ;;  %v1334_v37 = vld [vmem:[#allocation7 + $0x294] ss:$8 sps:$4 sm:$0xff]   ;;  %v1338_v39 = vld [vmem:[#allocation7 + $0x290] ss:$8 sps:$4 sm:$0xff]  }
  0x46   :  { %v1336_v38 = vld [vmem:[#allocation7 + $0x94] ss:$8 sps:$4 sm:$0xff]   ;;  %v1339_v40 = vld [vmem:[#allocation7 + $0x90] ss:$8 sps:$4 sm:$0xff]   ;;  %v1340_v41 = vld [vmem:[#allocation7 + $0x2a4] ss:$8 sps:$4 sm:$0xff]  }
  0x47   :  { %549 = vmatpush1.bf16.msra.mxu1 %v1302_v15  ;;  %v1342_v42 = vld [vmem:[#allocation7 + $0xa4] ss:$8 sps:$4 sm:$0xff]   ;;  %v1344_v43 = vld [vmem:[#allocation7 + $0x2a0] ss:$8 sps:$4 sm:$0xff]   ;;  %v1346_v45 = vld [vmem:[#allocation7 + $0x2b4] ss:$8 sps:$4 sm:$0xff]  }
  0x48   :  { %975 = vmatpush1.bf16.msra.mxu0 %v1303_v16  ;;  %550 = vmatprep.subr.bf16.mxu1 %v1304_v17  ;;  %v1345_v44 = vld [vmem:[#allocation7 + $0xa0] ss:$8 sps:$4 sm:$0xff]   ;;  %v1348_v46 = vld [vmem:[#allocation7 + $0xb4] ss:$8 sps:$4 sm:$0xff]   ;;  %v1350_v47 = vld [vmem:[#allocation7 + $0x2b0] ss:$8 sps:$4 sm:$0xff]  }
  0x49   :  { %976 = vmatprep.subr.bf16.mxu0 %v1306_v18  ;;  %v1351_v48 = vld [vmem:[#allocation7 + $0xb0] ss:$8 sps:$4 sm:$0xff]   ;;  %v1378_v49 = vld [vmem:[#allocation5 + $0x4] ss:$16 sps:$4 sm:$0xff]   ;;  %v1356_v53 = vld [vmem:[#allocation7 + $0x2c0] ss:$8 sps:$4 sm:$0xff]  }
  0x4a   :  { %v1352_v50 = vld [vmem:[#allocation7 + $0x2c4] ss:$8 sps:$4 sm:$0xff]   ;;  %574 = vmatprep.mubr.bf16.mxu1 %v1378_v49  ;;  %v1357_v54 = vld [vmem:[#allocation7 + $0xc0] ss:$8 sps:$4 sm:$0xff]   ;;  %v1358_v55 = vld [vmem:[#allocation7 + $0x2d4] ss:$8 sps:$4 sm:$0xff]  }
  0x4b   :  { %551 = vmatpush1.bf16.msra.mxu1 %v1308_v19  ;;  %v1354_v51 = vld [vmem:[#allocation7 + $0xc4] ss:$8 sps:$4 sm:$0xff]   ;;  %v1360_v56 = vld [vmem:[#allocation7 + $0xd4] ss:$8 sps:$4 sm:$0xff]   ;;  %v1362_v57 = vld [vmem:[#allocation7 + $0x2d0] ss:$8 sps:$4 sm:$0xff]  }
  0x4c   :  { %977 = vmatpush1.bf16.msra.mxu0 %v1309_v20  ;;  %552 = vmatprep.subr.bf16.mxu1 %v1310_v21  ;;  %v1384_v52 = vld [vmem:[#allocation3 + $0x4] ss:$16 sps:$4 sm:$0xff]   ;;  %v1363_v58 = vld [vmem:[#allocation7 + $0xd0] ss:$8 sps:$4 sm:$0xff]   ;;  %v1368_v61 = vld [vmem:[#allocation7 + $0x2e0] ss:$8 sps:$4 sm:$0xff]  }
  0x4d   :  { %978 = vmatprep.subr.bf16.mxu0 %v1312_v22  ;;  %1000 = vmatprep.mubr.bf16.mxu0 %v1384_v52  ;;  %v1364_v59 = vld [vmem:[#allocation7 + $0x2e4] ss:$8 sps:$4 sm:$0xff]   ;;  %v1369_v62 = vld [vmem:[#allocation7 + $0xe0] ss:$8 sps:$4 sm:$0xff]   ;;  %v1370_v63 = vld [vmem:[#allocation7 + $0x2f4] ss:$8 sps:$4 sm:$0xff]  }
  0x4e   :  { %v1366_v60 = vld [vmem:[#allocation7 + $0xe4] ss:$8 sps:$4 sm:$0xff]   ;;  %v1372_v0 = vld [vmem:[#allocation7 + $0xf4] ss:$8 sps:$4 sm:$0xff]   ;;  %v1374_v1 = vld [vmem:[#allocation7 + $0x2f0] ss:$8 sps:$4 sm:$0xff]  }
  0x4f   :  { %553 = vmatpush1.bf16.msra.mxu1 %v1314_v23  ;;  %v1375_v2 = vld [vmem:[#allocation7 + $0xf0] ss:$8 sps:$4 sm:$0xff]   ;;  %v1381_v3 = vld [vmem:[#allocation7 + $0x304] ss:$8 sps:$4 sm:$0xff]   ;;  %v1379_v6 = vld [vmem:[#allocation7 + $0x300] ss:$8 sps:$4 sm:$0xff]  }
  0x50   :  { %979 = vmatpush1.bf16.msra.mxu0 %v1315_v24  ;;  %554 = vmatprep.subr.bf16.mxu1 %v1316_v25  ;;  %v1387_v4 = vld [vmem:[#allocation7 + $0x104] ss:$8 sps:$4 sm:$0xff]   ;;  %v1376_v5 = vld [vmem:[#allocation5] ss:$16 sps:$4 sm:$0xff]   ;;  %v1390_v9 = vld [vmem:[#allocation7 + $0x314] ss:$8 sps:$4 sm:$0xff]  }
  0x51   :  { %980 = vmatprep.subr.bf16.mxu0 %v1318_v26  ;;  %v1382_v7 = vld [vmem:[#allocation3] ss:$16 sps:$4 sm:$0xff]   ;;  %v1393_v10 = vld [vmem:[#allocation7 + $0x114] ss:$8 sps:$4 sm:$0xff]   ;;  %v1396_v13 = vld [vmem:[#allocation7 + $0x324] ss:$8 sps:$4 sm:$0xff]  }
  0x52   :  { %v1385_v8 = vld [vmem:[#allocation7 + $0x100] ss:$8 sps:$4 sm:$0xff]   ;;  %v1388_v11 = vld [vmem:[#allocation7 + $0x310] ss:$8 sps:$4 sm:$0xff]   ;;  %v1399_v14 = vld [vmem:[#allocation7 + $0x124] ss:$8 sps:$4 sm:$0xff]  }
  0x53   :  { %555 = vmatpush1.bf16.msra.mxu1 %v1320_v27  ;;  %v1391_v12 = vld [vmem:[#allocation7 + $0x110] ss:$8 sps:$4 sm:$0xff]   ;;  %v1394_v15 = vld [vmem:[#allocation7 + $0x320] ss:$8 sps:$4 sm:$0xff]   ;;  %v1402_v17 = vld [vmem:[#allocation7 + $0x334] ss:$8 sps:$4 sm:$0xff]  }
  0x54   :  { %981 = vmatpush1.bf16.msra.mxu0 %v1321_v28  ;;  %556 = vmatprep.subr.bf16.mxu1 %v1322_v29  ;;  %v1397_v16 = vld [vmem:[#allocation7 + $0x120] ss:$8 sps:$4 sm:$0xff]   ;;  %v1405_v18 = vld [vmem:[#allocation7 + $0x134] ss:$8 sps:$4 sm:$0xff]   ;;  %v1400_v19 = vld [vmem:[#allocation7 + $0x330] ss:$8 sps:$4 sm:$0xff]  }
  0x55   :  { %982 = vmatprep.subr.bf16.mxu0 %v1324_v30  ;;  %v1403_v20 = vld [vmem:[#allocation7 + $0x130] ss:$8 sps:$4 sm:$0xff]   ;;  %v1408_v21 = vld [vmem:[#allocation7 + $0x344] ss:$8 sps:$4 sm:$0xff]   ;;  %v1406_v23 = vld [vmem:[#allocation7 + $0x340] ss:$8 sps:$4 sm:$0xff]  }
  0x56   :  { %v1411_v22 = vld [vmem:[#allocation7 + $0x144] ss:$8 sps:$4 sm:$0xff]   ;;  %v1409_v24 = vld [vmem:[#allocation7 + $0x140] ss:$8 sps:$4 sm:$0xff]   ;;  %v1414_v25 = vld [vmem:[#allocation7 + $0x354] ss:$8 sps:$4 sm:$0xff]  }
  0x57   :  { %557 = vmatpush1.bf16.msra.mxu1 %v1326_v31  ;;  %v1417_v26 = vld [vmem:[#allocation7 + $0x154] ss:$8 sps:$4 sm:$0xff]   ;;  %v1412_v27 = vld [vmem:[#allocation7 + $0x350] ss:$8 sps:$4 sm:$0xff]   ;;  %v1420_v29 = vld [vmem:[#allocation7 + $0x364] ss:$8 sps:$4 sm:$0xff]  }
  0x58   :  { %983 = vmatpush1.bf16.msra.mxu0 %v1327_v32  ;;  %558 = vmatprep.subr.bf16.mxu1 %v1328_v33  ;;  %v1415_v28 = vld [vmem:[#allocation7 + $0x150] ss:$8 sps:$4 sm:$0xff]   ;;  %v1423_v30 = vld [vmem:[#allocation7 + $0x164] ss:$8 sps:$4 sm:$0xff]   ;;  %v1418_v31 = vld [vmem:[#allocation7 + $0x360] ss:$8 sps:$4 sm:$0xff]  }
  0x59   :  { %984 = vmatprep.subr.bf16.mxu0 %v1330_v34  ;;  %v1421_v32 = vld [vmem:[#allocation7 + $0x160] ss:$8 sps:$4 sm:$0xff]   ;;  %v1426_v33 = vld [vmem:[#allocation7 + $0x374] ss:$8 sps:$4 sm:$0xff]   ;;  %vm1115_vm0 = vcmask 7168  }
  0x5a   :  { %v1429_v34 = vld [vmem:[#allocation7 + $0x174] ss:$8 sps:$4 sm:$0xff]   ;;  %v1442_v49 = vld [vmem:[#allocation7 + $0x3a0] ss:$8 sps:$4 sm:$0xff]  }
  0x5b   :  { %559 = vmatpush1.bf16.msra.mxu1 %v1332_v35  ;;  %v1480_v35 = vld [vmem:[#allocation5 + $0xc] ss:$16 sps:$4 sm:$0xff]  }
  0x5c   :  { %985 = vmatpush1.bf16.msra.mxu0 %v1333_v36  ;;  %560 = vmatprep.subr.bf16.mxu1 %v1334_v37  ;;  %v1483_v36 = vld [vmem:[#allocation3 + $0xc] ss:$16 sps:$4 sm:$0xff]   ;;  %v1424_v37 = vld [vmem:[#allocation7 + $0x370] ss:$8 sps:$4 sm:$0xff]  }
  0x5d   :  { %986 = vmatprep.subr.bf16.mxu0 %v1336_v38  ;;  %v1427_v38 = vld [vmem:[#allocation7 + $0x170] ss:$8 sps:$4 sm:$0xff]   ;;  %v1453_v52 = vld [vmem:[#allocation7 + $0x1b4] ss:$8 sps:$4 sm:$0xff]  }
  0x5f   :  { %561 = vmatpush1.bf16.msra.mxu1 %v1338_v39  ;;  %v1432_v39 = vld [vmem:[#allocation7 + $0x384] ss:$8 sps:$4 sm:$0xff]  }
  0x60   :  { %987 = vmatpush1.bf16.msra.mxu0 %v1339_v40  ;;  %562 = vmatprep.subr.bf16.mxu1 %v1340_v41  ;;  %v1435_v40 = vld [vmem:[#allocation7 + $0x184] ss:$8 sps:$4 sm:$0xff]   ;;  %v1430_v41 = vld [vmem:[#allocation7 + $0x380] ss:$8 sps:$4 sm:$0xff]  }
  0x61   :  { %988 = vmatprep.subr.bf16.mxu0 %v1342_v42  ;;  %v1433_v42 = vld [vmem:[#allocation7 + $0x180] ss:$8 sps:$4 sm:$0xff]  }
  0x63   :  { %563 = vmatpush1.bf16.msra.mxu1 %v1344_v43  ;;  %v1438_v43 = vld [vmem:[#allocation7 + $0x394] ss:$8 sps:$4 sm:$0xff]  }
  0x64   :  { %989 = vmatpush1.bf16.msra.mxu0 %v1345_v44  ;;  %564 = vmatprep.subr.bf16.mxu1 %v1346_v45  ;;  %v1441_v44 = vld [vmem:[#allocation7 + $0x194] ss:$8 sps:$4 sm:$0xff]   ;;  %v1436_v45 = vld [vmem:[#allocation7 + $0x390] ss:$8 sps:$4 sm:$0xff]  }
  0x65   :  { %990 = vmatprep.subr.bf16.mxu0 %v1348_v46  ;;  %v1439_v46 = vld [vmem:[#allocation7 + $0x190] ss:$8 sps:$4 sm:$0xff]  }
  0x67   :  { %565 = vmatpush1.bf16.msra.mxu1 %v1350_v47  ;;  %v1444_v47 = vld [vmem:[#allocation7 + $0x3a4] ss:$8 sps:$4 sm:$0xff]  }
  0x68   :  { %991 = vmatpush1.bf16.msra.mxu0 %v1351_v48  ;;  %566 = vmatprep.subr.bf16.mxu1 %v1352_v50  ;;  %v1447_v48 = vld [vmem:[#allocation7 + $0x1a4] ss:$8 sps:$4 sm:$0xff]   ;;  %v1445_v50 = vld [vmem:[#allocation7 + $0x1a0] ss:$8 sps:$4 sm:$0xff]  }
  0x69   :  { %992 = vmatprep.subr.bf16.mxu0 %v1354_v51  ;;  %v1450_v51 = vld [vmem:[#allocation7 + $0x3b4] ss:$8 sps:$4 sm:$0xff]  }
  0x6b   :  { %567 = vmatpush1.bf16.msra.mxu1 %v1356_v53  ;;  %v1448_v53 = vld [vmem:[#allocation7 + $0x3b0] ss:$8 sps:$4 sm:$0xff]  }
  0x6c   :  { %993 = vmatpush1.bf16.msra.mxu0 %v1357_v54  ;;  %568 = vmatprep.subr.bf16.mxu1 %v1358_v55  ;;  %v1451_v54 = vld [vmem:[#allocation7 + $0x1b0] ss:$8 sps:$4 sm:$0xff]   ;;  %v1456_v55 = vld [vmem:[#allocation7 + $0x3c4] ss:$8 sps:$4 sm:$0xff]  }
  0x6d   :  { %994 = vmatprep.subr.bf16.mxu0 %v1360_v56  ;;  %v1459_v56 = vld [vmem:[#allocation7 + $0x1c4] ss:$8 sps:$4 sm:$0xff]  }
  0x6f   :  { %569 = vmatpush1.bf16.msra.mxu1 %v1362_v57  ;;  %v1454_v57 = vld [vmem:[#allocation7 + $0x3c0] ss:$8 sps:$4 sm:$0xff]  }
  0x70   :  { %995 = vmatpush1.bf16.msra.mxu0 %v1363_v58  ;;  %570 = vmatprep.subr.bf16.mxu1 %v1364_v59  ;;  %v1457_v58 = vld [vmem:[#allocation7 + $0x1c0] ss:$8 sps:$4 sm:$0xff]   ;;  %v1462_v59 = vld [vmem:[#allocation7 + $0x3d4] ss:$8 sps:$4 sm:$0xff]  }
  0x71   :  { %996 = vmatprep.subr.bf16.mxu0 %v1366_v60  ;;  %v1465_v60 = vld [vmem:[#allocation7 + $0x1d4] ss:$8 sps:$4 sm:$0xff]  }
  0x73   :  { %571 = vmatpush1.bf16.msra.mxu1 %v1368_v61  ;;  %v1460_v61 = vld [vmem:[#allocation7 + $0x3d0] ss:$8 sps:$4 sm:$0xff]  }
  0x74   :  { %997 = vmatpush1.bf16.msra.mxu0 %v1369_v62  ;;  %572 = vmatprep.subr.bf16.mxu1 %v1370_v63  ;;  %v1463_v62 = vld [vmem:[#allocation7 + $0x1d0] ss:$8 sps:$4 sm:$0xff]   ;;  %v1468_v63 = vld [vmem:[#allocation7 + $0x3e4] ss:$8 sps:$4 sm:$0xff]  }
  0x75   :  { %998 = vmatprep.subr.bf16.mxu0 %v1372_v0  ;;  %v1471_v0 = vld [vmem:[#allocation7 + $0x1e4] ss:$8 sps:$4 sm:$0xff]  }
  0x77   :  { %573 = vmatpush1.bf16.msra.mxu1 %v1374_v1  ;;  %v1466_v1 = vld [vmem:[#allocation7 + $0x3e0] ss:$8 sps:$4 sm:$0xff]  }
  0x78   :  { %999 = vmatpush1.bf16.msra.mxu0 %v1375_v2  ;;  %585 = vmatprep.subr.bf16.mxu1 %v1381_v3  ;;  %v1469_v2 = vld [vmem:[#allocation7 + $0x1e0] ss:$8 sps:$4 sm:$0xff]   ;;  %v1474_v3 = vld [vmem:[#allocation7 + $0x3f4] ss:$8 sps:$4 sm:$0xff]  }
  0x79   :  { %1011 = vmatprep.subr.bf16.mxu0 %v1387_v4  ;;  %v1477_v4 = vld [vmem:[#allocation7 + $0x1f4] ss:$8 sps:$4 sm:$0xff]  }
  0x7a   :  { %575 = vmatmul.mubr.bf16.vlgmr.msra.gmra.mrb[0].mxu1 %v1376_v5  ;;  %v1472_v5 = vld [vmem:[#allocation7 + $0x3f0] ss:$8 sps:$4 sm:$0xff]  }
  0x7b   :  { %1001 = vmatmul.mubr.bf16.vlgmr.msra.gmra.mrb[0].mxu0 %v1382_v7  ;;  %586 = vmatpush1.bf16.msra.mxu1 %v1379_v6  ;;  %v1475_v6 = vld [vmem:[#allocation7 + $0x1f0] ss:$8 sps:$4 sm:$0xff]  }
  0x7c   :  { %1012 = vmatpush1.bf16.msra.mxu0 %v1385_v8  ;;  %587 = vmatprep.subr.bf16.mxu1 %v1390_v9  ;;  %v1478_v7 = vld [vmem:[#allocation5 + $0x8] ss:$16 sps:$4 sm:$0xff]   ;;  %v1056_v9 = vlaneseq }
  0x7d   :  { %1013 = vmatprep.subr.bf16.mxu0 %v1393_v10  ;;  %617 = vmatprep.mubr.bf16.mxu1 %v1480_v35  ;;  %v1481_v8 = vld [vmem:[#allocation3 + $0x8] ss:$16 sps:$4 sm:$0xff]  }
  0x7e   :  { %1043 = vmatprep.mubr.bf16.mxu0 %v1483_v36  ;;  %v1057_v10 = vshrl.u32 %v1056_v9, 7 }
  0x7f   :  { %588 = vmatpush1.bf16.msra.mxu1 %v1388_v11 }
  0x80   :  { %1014 = vmatpush1.bf16.msra.mxu0 %v1391_v12  ;;  %589 = vmatprep.subr.bf16.mxu1 %v1396_v13  ;;  %v1058_v11 = vsub.s32 0, %v1057_v10  ;;  %v1054_v12 = vld [vmem:[%s1665_s3] sm:$0x3]  ;;  %v1062_v13 = vsub.s32 1, %v1057_v10 }
  0x81   :  { %1015 = vmatprep.subr.bf16.mxu0 %v1399_v14 }
  0x82   :  { %v1059_v14 = vrot.slane %v1054_v12, %v1058_v11 }
  0x83   :  { %590 = vmatpush1.bf16.msra.mxu1 %v1394_v15 }
  0x84   :  { %1016 = vmatpush1.bf16.msra.mxu0 %v1397_v16  ;;  %591 = vmatprep.subr.bf16.mxu1 %v1402_v17  ;;  %v1063_v17 = vrot.slane %v1054_v12, %v1062_v13 }
  0x85   :  { %1017 = vmatprep.subr.bf16.mxu0 %v1405_v18  ;;  %v1074_v18 = vld [vmem:[%s1666_s4] sm:$0x3] }
  0x87   :  { %592 = vmatpush1.bf16.msra.mxu1 %v1400_v19 }
  0x88   :  { %1018 = vmatpush1.bf16.msra.mxu0 %v1403_v20  ;;  %593 = vmatprep.subr.bf16.mxu1 %v1408_v21 }
  0x89   :  { %1019 = vmatprep.subr.bf16.mxu0 %v1411_v22 }
  0x8b   :  { %594 = vmatpush1.bf16.msra.mxu1 %v1406_v23 }
  0x8c   :  { %1020 = vmatpush1.bf16.msra.mxu0 %v1409_v24  ;;  %595 = vmatprep.subr.bf16.mxu1 %v1414_v25 }
  0x8d   :  { %1021 = vmatprep.subr.bf16.mxu0 %v1417_v26 }
  0x8f   :  { %596 = vmatpush1.bf16.msra.mxu1 %v1412_v27 }
  0x90   :  { %1022 = vmatpush1.bf16.msra.mxu0 %v1415_v28  ;;  %597 = vmatprep.subr.bf16.mxu1 %v1420_v29  ;;  %v1079_v29 = vrot.slane %v1074_v18, %v1058_v11 }
  0x91   :  { %1023 = vmatprep.subr.bf16.mxu0 %v1423_v30 }
  0x93   :  { %598 = vmatpush1.bf16.msra.mxu1 %v1418_v31 }
  0x94   :  { %1024 = vmatpush1.bf16.msra.mxu0 %v1421_v32  ;;  %599 = vmatprep.subr.bf16.mxu1 %v1426_v33  ;;  %v1083_v32 = vrot.slane %v1074_v18, %v1062_v13 }
  0x95   :  { %1025 = vmatprep.subr.bf16.mxu0 %v1429_v34 }
  0x97   :  { %600 = vmatpush1.bf16.msra.mxu1 %v1424_v37 }
  0x98   :  { %1026 = vmatpush1.bf16.msra.mxu0 %v1427_v38  ;;  %601 = vmatprep.subr.bf16.mxu1 %v1432_v39 }
  0x99   :  { %1027 = vmatprep.subr.bf16.mxu0 %v1435_v40 }
  0x9b   :  { %602 = vmatpush1.bf16.msra.mxu1 %v1430_v41 }
  0x9c   :  { %1028 = vmatpush1.bf16.msra.mxu0 %v1433_v42  ;;  %603 = vmatprep.subr.bf16.mxu1 %v1438_v43 }
  0x9d   :  { %1029 = vmatprep.subr.bf16.mxu0 %v1441_v44 }
  0x9f   :  { %604 = vmatpush1.bf16.msra.mxu1 %v1436_v45  ;;  %v1260_v45 = vld [vmem:[#allocation2] ss:$0 sm:$0xff] }
  0xa0   :  { %1030 = vmatpush1.bf16.msra.mxu0 %v1439_v46  ;;  %605 = vmatprep.subr.bf16.mxu1 %v1444_v47 }
  0xa1   :  { %1031 = vmatprep.subr.bf16.mxu0 %v1447_v48 }
  0xa3   :  { %606 = vmatpush1.bf16.msra.mxu1 %v1442_v49 }
  0xa4   :  { %1032 = vmatpush1.bf16.msra.mxu0 %v1445_v50  ;;  %607 = vmatprep.subr.bf16.mxu1 %v1450_v51 }
  0xa5   :  { %1033 = vmatprep.subr.bf16.mxu0 %v1453_v52 }
  0xa7   :  { %608 = vmatpush1.bf16.msra.mxu1 %v1448_v53 }
  0xa8   :  { %1034 = vmatpush1.bf16.msra.mxu0 %v1451_v54  ;;  %609 = vmatprep.subr.bf16.mxu1 %v1456_v55 }
  0xa9   :  { %1035 = vmatprep.subr.bf16.mxu0 %v1459_v56 }
  0xab   :  { %610 = vmatpush1.bf16.msra.mxu1 %v1454_v57 }
  0xac   :  { %1036 = vmatpush1.bf16.msra.mxu0 %v1457_v58  ;;  %611 = vmatprep.subr.bf16.mxu1 %v1462_v59 }
  0xad   :  { %1037 = vmatprep.subr.bf16.mxu0 %v1465_v60 }
  0xaf   :  { %612 = vmatpush1.bf16.msra.mxu1 %v1460_v61 }
  0xb0   :  { %1038 = vmatpush1.bf16.msra.mxu0 %v1463_v62  ;;  %613 = vmatprep.subr.bf16.mxu1 %v1468_v63 }
  0xb1   :  { %1039 = vmatprep.subr.bf16.mxu0 %v1471_v0 }
  0xb3   :  { %614 = vmatpush1.bf16.msra.mxu1 %v1466_v1 }
  0xb4   :  { %1040 = vmatpush1.bf16.msra.mxu0 %v1469_v2  ;;  %615 = vmatprep.subr.bf16.mxu1 %v1474_v3 }
  0xb5   :  { %1041 = vmatprep.subr.bf16.mxu0 %v1477_v4 }
  0xb7   :  { %616 = vmatpush1.bf16.msra.mxu1 %v1472_v5 }
  0xb8   :  { %1042 = vmatpush1.bf16.msra.mxu0 %v1475_v6 }
  0xba   :  { %618 = vmatmul.mubr.bf16.vlgmr.msra.gmra.mrb[0].mxu1 %v1478_v7 }
  0xbb   :  { %1044 = vmatmul.mubr.bf16.vlgmr.msra.gmra.mrb[0].mxu0 %v1481_v8 }
 0x18d   :  { %v619_v15 = vpop.f32.mrb[0].mxu1 }
 0x18e   :  { %v1045_v16 = vpop.f32.mrb[0].mxu0  ;;  %v621_v20 = vpop.f32.mrb[1].mxu1 }
 0x18f   :  { %v1261_v19 = vadd.f32 %v1045_v16, %v619_v15  ;;  %v1047_v21 = vpop.f32.mrb[1].mxu0  ;;  %v623_v23 = vpop.f32.mrb[2].mxu1 }
 0x190   :  { %v1262_v22 = vadd.f32 %v1047_v21, %v621_v20  ;;  %v1049_v24 = vpop.f32.mrb[2].mxu0  ;;  %v625_v27 = vpop.f32.mrb[3].mxu1 }
 0x191   :  { %v1066_v25 = vadd.f32 %v1261_v19, %v1059_v14  ;;  %v1263_v26 = vadd.f32 %v1049_v24, %v623_v23  ;;  %v1051_v28 = vpop.f32.mrb[3].mxu0 }
 0x192   :  { %v1067_v30 = vadd.f32 %v1262_v22, %v1063_v17  ;;  %v1264_v31 = vadd.f32 %v1051_v28, %v625_v27 }
 0x193   :  { %v1070_v33 = vmax.f32 %v1066_v25, 0.0  ;;  %v1068_v34 = vadd.f32 %v1263_v26, %v1059_v14 }
 0x194   :  { %v1071_v35 = vmax.f32 %v1067_v30, 0.0  ;;  %v1069_v36 = vadd.f32 %v1264_v31, %v1063_v17 }
 0x195   :  { %v1072_v37 = vmax.f32 %v1068_v34, 0.0  ;;  %v1086_v38 = vmul.f32 %v1079_v29, %v1070_v33 }
 0x196   :  { %v1073_v39 = vmax.f32 %v1069_v36, 0.0  ;;  %v1087_v40 = vmul.f32 %v1083_v32, %v1071_v35 }
 0x197   :  { %v1088_v41 = vmul.f32 %v1079_v29, %v1072_v37 }
 0x198   :  { %v1090_v42 = vadd.f32 %v1087_v40, %v1086_v38  ;;  %v1089_v43 = vmul.f32 %v1083_v32, %v1073_v39 }
 0x19a   :  { %1091 = vadd.xlane.f32.xlu0 %v1090_v42  ;;  %v1093_v44 = vadd.f32 %v1089_v43, %v1088_v41 }
 0x19e   :  { %1094 = vadd.xlane.f32.xlu0 %v1093_v44 }
 0x227   :  { %v1092_v46 = vpop.xlane.xlu0 %1091 }
 0x228   :  { %v1103_v47 = vadd.f32 %v1260_v45, %v1092_v46 }
 0x22a   :  { %v1105_v48 = vsub.f32 0.0, %v1103_v47 }
 0x22b   :  { %v1095_v49 = vpop.xlane.xlu0 %1094 }
 0x22c   :  { %v1107_v50 = vmul.f32 1.442695, %v1105_v48  ;;  %v1104_v51 = vadd.f32 %v1260_v45, %v1095_v49 }
 0x22e   :  { %1484 = vpow2.f32 %v1107_v50  ;;  %v1106_v52 = vsub.f32 0.0, %v1104_v51 }
 0x230   :  { %v1109_v53 = vmul.f32 1.442695, %v1106_v52 }
 0x232   :  { %1486 = vpow2.f32 %v1109_v53 }
 0x238   :  { %v1485_v54 = vpop.eup %1484 }
 0x239   :  { %v1111_v55 = vadd.f32 1.0, %v1485_v54 }
 0x23b   :  { %1488 = vrcp.f32 %v1111_v55 }
 0x23c   :  { %v1487_v56 = vpop.eup %1486 }
 0x23d   :  { %v1112_v57 = vadd.f32 1.0, %v1487_v56 }
 0x23f   :  { %1490 = vrcp.f32 %v1112_v57 }
 0x245   :  { %v1489_v58 = vpop.eup %1488 }
 0x246   :  { %1116 = vst.msk [vmem:[%s1668_s6] sm:$0xff] %vm1115_vm0, %v1489_v58 }
 0x249   :  { %v1491_v59 = vpop.eup %1490 }
 0x24a   :  { %1117 = vst.msk [vmem:[%s1668_s6 + $0x8] sm:$0xff] %vm1115_vm0, %v1491_v59 }
 0x24b   :  { %1122 = vsyncpa [#allocation4], 1 }
 0x24c   :  { %1123 = vsyncpa [#allocation6], 1 }

</bundles_post_ra>
